<compile_context>
chip_gen: v5e
topology: v5e:2x2
jax: 0.10.0
libtpu: 0.0.40
codegen_flags: <defaults>
</compile_context>

<pallas_src>
import jax
import jax.numpy as jnp
import numpy as np
from jax.experimental import pallas as pl
from jax.experimental.pallas import tpu as pltpu


# ----------------------------------------------------------------------------
# Pass 1: |DFT| + per-tile partial sums (per-lane, so the in-kernel reduction is
# only across sublanes; the tiny lane/tile reduction is finished in the wrapper).
# ----------------------------------------------------------------------------
def _dft_stats_kernel(x_ref, basis_ref, psum_ref):
    FP = psum_ref.shape[2]                                            # 128-lane padded
    xb = x_ref[...].astype(jnp.bfloat16)                              # (TB, F)
    cs = jnp.dot(xb, basis_ref[...],
                 preferred_element_type=jnp.float32)                  # (TB, 2*FP) f32
    re = cs[:, :FP]                                                   # vreg-aligned slices
    im = cs[:, FP:]
    mag = jnp.sqrt(re * re + im * im)                                 # (TB, FP); padded lanes == 0
    psum_ref[0, 0:1, :] = jnp.sum(mag, axis=0, keepdims=True)         # per-lane sum
    psum_ref[0, 1:2, :] = jnp.sum(mag * mag, axis=0, keepdims=True)   # per-lane sum of squares


# ----------------------------------------------------------------------------
# Pass 2: recompute |DFT|, normalize with the GLOBAL stats, run the MLP.
# ----------------------------------------------------------------------------
def _mlp_kernel(stats_ref, x_ref, basis_ref,
                w1_ref, b1_ref, w2_ref, b2_ref, w3_ref, b3_ref,
                out_ref):
    FP = w1_ref.shape[0]
    TB = x_ref.shape[0]

    xb = x_ref[...].astype(jnp.bfloat16)
    cs = jnp.dot(xb, basis_ref[...],
                 preferred_element_type=jnp.float32)                  # (TB, 2*FP)
    re = cs[:, :FP]
    im = cs[:, FP:]
    mag = jnp.sqrt(re * re + im * im)                                 # (TB, FP) f32

    mu = stats_ref[0:1, :]                                            # (1, FP) broadcast rows
    rstd = stats_ref[1:2, :]
    # Padded lanes become (-mu)*rstd but contract against zero-padded w1 rows -> no effect.
    z = (mag - mu) * rstd                                             # (TB, FP) f32

    h1 = jnp.maximum(
        jnp.dot(z.astype(jnp.bfloat16), w1_ref[...],
                preferred_element_type=jnp.float32) + b1_ref[...], 0.0)   # (TB, H)
    h2 = jnp.maximum(
        jnp.dot(h1.astype(jnp.bfloat16), w2_ref[...],
                preferred_element_type=jnp.float32) + b2_ref[...], 0.0)   # (TB, H)

    # Lane-packed logits: (1, H) @ (H, TB) -> (1, TB) row (single XLU transpose of h2).
    logit_row = jnp.dot(w3_ref[...], h2.T,
                        preferred_element_type=jnp.float32) + b3_ref[...]  # (1, TB)
    out_ref[...] = logit_row.reshape(1, 1, TB)


# ----------------------------------------------------------------------------
# Parameter / basis construction (hoisted out of the call path).
# ----------------------------------------------------------------------------
def _feat_pad(in_dim):
    return ((in_dim + 127) // 128) * 128                              # >= 128


def make_dft_basis(in_dim):
    """Fused, lane-padded [cos | sin] DFT basis: (F, 2*FP) bf16, FP = roundup(F,128).
    cos occupies lanes 0..F-1, sin occupies lanes FP..FP+F-1; padded lanes are zero."""
    FP = _feat_pad(in_dim)
    n = np.arange(in_dim)[:, None]
    k = np.arange(in_dim)[None, :]
    ang = 2.0 * np.pi * n * k / in_dim
    basis = np.zeros((in_dim, 2 * FP), np.float32)
    basis[:, :in_dim] = np.cos(ang)
    basis[:, FP:FP + in_dim] = np.sin(ang)
    return jnp.asarray(basis, dtype=jnp.bfloat16)


def init_params(key, in_dim, hidden_dim=128):
    """PyTorch-style Linear init U(-1/sqrt(fan_in), 1/sqrt(fan_in)). Weights stored
    pre-transposed as (in, out); w1 input rows zero-padded to the 128-lane feature
    width; big weights in bf16 for the MXU, biases and the tiny w3 row in f32."""
    FP = _feat_pad(in_dim)
    ks = jax.random.split(key, 6)

    def lin(kw, kb, fan_in, fan_out):
        bound = 1.0 / np.sqrt(fan_in)
        w = jax.random.uniform(kw, (fan_in, fan_out), jnp.float32, -bound, bound)
        b = jax.random.uniform(kb, (1, fan_out), jnp.float32, -bound, bound)
        return w, b

    w1, b1 = lin(ks[0], ks[1], in_dim, hidden_dim)
    w2, b2 = lin(ks[2], ks[3], hidden_dim, hidden_dim)
    w3, b3 = lin(ks[4], ks[5], hidden_dim, 1)

    w1_pad = jnp.zeros((FP, hidden_dim), jnp.float32).at[:in_dim, :].set(w1)

    return dict(
        w1=w1_pad.astype(jnp.bfloat16), b1=b1,
        w2=w2.astype(jnp.bfloat16), b2=b2,
        w3=jnp.transpose(w3),                      # (1, hidden) row, f32
        b3=b3.reshape(1, 1),                       # (1, 1) f32
    )


def _pick_batch_tile(batch):
    # M=256 fills v6e/v7x MXU rows (2x256x256); 128-512 already matches v5e (4x128x128).
    for tb in (256, 128, 64, 32, 16, 8):
        if batch % tb == 0:
            return tb
    return batch


# ----------------------------------------------------------------------------
# Wrapper: two pallas_calls + tiny scalar glue for the global mean / unbiased std.
# ----------------------------------------------------------------------------
def simple_binary_classifier(x, params, basis, *, batch_tile=None):
    """x: (B, in_dim) float32. Returns (B, 1) float32 logits."""
    B, F = x.shape
    FP, H = params["w1"].shape
    assert basis.shape == (F, 2 * FP)

    if batch_tile is None or B % batch_tile != 0:
        batch_tile = _pick_batch_tile(B)
    TB = batch_tile
    num_tiles = B // TB

    cparams = pltpu.CompilerParams(
        dimension_semantics=("parallel",),          # v7x: shard batch tiles over 2 TCs
        vmem_limit_bytes=32 * 1024 * 1024,
    )

    # ---- pass 1: per-tile per-lane (sum, sum-of-squares) of |DFT(x)| --------------
    psums = pl.pallas_call(
        _dft_stats_kernel,
        grid=(num_tiles,),
        in_specs=[
            pl.BlockSpec((TB, F), lambda i: (i, 0)),
            pl.BlockSpec((F, 2 * FP), lambda i: (0, 0)),
        ],
        out_specs=pl.BlockSpec((1, 2, FP), lambda i: (i, 0, 0)),
        out_shape=jax.ShapeDtypeStruct((num_tiles, 2, FP), jnp.float32),
        compiler_params=cparams,
    )(x, basis)

    # ---- global stats: one-pass mean / unbiased variance; n = B*F (NOT padded) ----
    n = B * F
    s = jnp.sum(psums[:, 0, :])
    ss = jnp.sum(psums[:, 1, :])
    mu = s / n
    var = (ss - n * mu * mu) / (n - 1)
    rstd = jax.lax.rsqrt(var)
    stats = jnp.concatenate(
        [jnp.broadcast_to(mu, (1, FP)), jnp.broadcast_to(rstd, (1, FP))], axis=0
    ).astype(jnp.float32)                                              # (2, FP)

    # ---- pass 2: normalize + MLP, lane-packed logit row per batch tile ------------
    out = pl.pallas_call(
        _mlp_kernel,
        grid=(num_tiles,),
        in_specs=[
            pl.BlockSpec((2, FP), lambda i: (0, 0)),       # stats (mu row, rstd row)
            pl.BlockSpec((TB, F), lambda i: (i, 0)),       # x batch tile
            pl.BlockSpec((F, 2 * FP), lambda i: (0, 0)),   # DFT basis
            pl.BlockSpec((FP, H), lambda i: (0, 0)),       # w1 (input rows padded)
            pl.BlockSpec((1, H), lambda i: (0, 0)),        # b1
            pl.BlockSpec((H, H), lambda i: (0, 0)),        # w2
            pl.BlockSpec((1, H), lambda i: (0, 0)),        # b2
            pl.BlockSpec((1, H), lambda i: (0, 0)),        # w3 row
            pl.BlockSpec((1, 1), lambda i: (0, 0)),        # b3
        ],
        out_specs=pl.BlockSpec((1, 1, TB), lambda i: (i, 0, 0)),
        out_shape=jax.ShapeDtypeStruct((num_tiles, 1, TB), jnp.float32),
        compiler_params=cparams,
    )(stats, x, basis,
      params["w1"], params["b1"], params["w2"], params["b2"],
      params["w3"], params["b3"])

    return out.reshape(B, 1)


# ----------------------------------------------------------------------------
# Pure-JAX reference (same bf16 matmul precision as the kernel) for validation.
# Note: bf16 operands deviate ~0.3-0.5% relative from a pure-f32 PyTorch reference.
# ----------------------------------------------------------------------------
def reference_forward(x, params, basis):
    B, F = x.shape
    FP = params["w1"].shape[0]
    cs = jnp.dot(x.astype(jnp.bfloat16), basis, preferred_element_type=jnp.float32)
    re, im = cs[:, :FP], cs[:, FP:]
    mag = jnp.sqrt(re * re + im * im)
    n = B * F
    s, ss = jnp.sum(mag), jnp.sum(mag * mag)
    mu = s / n
    var = (ss - n * mu * mu) / (n - 1)
    z = (mag - mu) * jax.lax.rsqrt(var)
    h1 = jnp.maximum(jnp.dot(z.astype(jnp.bfloat16), params["w1"],
                             preferred_element_type=jnp.float32) + params["b1"], 0.0)
    h2 = jnp.maximum(jnp.dot(h1.astype(jnp.bfloat16), params["w2"],
                             preferred_element_type=jnp.float32) + params["b2"], 0.0)
    return jnp.dot(h2, jnp.transpose(params["w3"])) + params["b3"]     # (B, 1)


if __name__ == "__main__":
    key = jax.random.PRNGKey(0)
    k_x, k_p = jax.random.split(key)

    B, IN_DIM, HIDDEN = 16, 32, 128
    x = jax.random.normal(k_x, (B, IN_DIM), dtype=jnp.float32)
    params = init_params(k_p, IN_DIM, HIDDEN)
    basis = make_dft_basis(IN_DIM)                 # hoisted: built once per feature size

    # batch_tile=8 -> 2 batch tiles: exercises the grid and the two-pass global stats.
    logits = simple_binary_classifier(x, params, basis, batch_tile=8)
    jax.block_until_ready(logits)

    assert logits.shape == (B, 1) and logits.dtype == jnp.float32
    assert bool(jnp.all(jnp.isfinite(logits)))

    ref = reference_forward(x, params, basis)
    assert bool(jnp.allclose(logits, ref, atol=1e-2, rtol=1e-2)), (
        "kernel / reference mismatch", logits - ref)

    print("KERNEL_OK")
</pallas_src>

<mosaic_0001>
module attributes {stable_mosaic.version = 11 : i64} {
  func.func @_dft_stats_kernel(%arg0: i32, %arg1: memref<8x32xf32, #tpu.memory_space<vmem>>, %arg2: memref<32x256xbf16, #tpu.memory_space<vmem>>, %arg3: memref<1x2x128xf32, #tpu.memory_space<vmem>>) attributes {dimension_semantics = [#tpu.dimension_semantics<parallel>], iteration_bounds = array<i64: 2>, scalar_prefetch = 0 : i64, scratch_operands = 0 : i64, tpu.core_type = #tpu.core_type<tc>, window_params = [{transform_indices = @transform_0, window_bounds = array<i64: 8, 32>}, {pipeline_mode = #tpu.pipeline_mode<synchronous>, transform_indices = @transform_1, window_bounds = array<i64: 32, 256>}, {transform_indices = @transform_2, window_bounds = array<i64: 1, 2, 128>}]} {
    %c0 = arith.constant 0 : index
    %c0_0 = arith.constant 0 : index
    %0 = vector.load %arg1[%c0, %c0_0] : memref<8x32xf32, #tpu.memory_space<vmem>>, vector<8x32xf32>
    %1 = arith.truncf %0 : vector<8x32xf32> to vector<8x32xbf16>
    %c0_1 = arith.constant 0 : index
    %c0_2 = arith.constant 0 : index
    %2 = vector.load %arg2[%c0_1, %c0_2] : memref<32x256xbf16, #tpu.memory_space<vmem>>, vector<32x256xbf16>
    %cst = arith.constant dense<0.000000e+00> : vector<8x256xf32>
    %3 = tpu.matmul %1, %2, %cst {dimension_numbers = #tpu.dot_dimension_numbers<[1], [0], [0], [1], [0, 0, 1, 1], [], []>} : vector<8x32xbf16>, vector<32x256xbf16>, vector<8x256xf32> -> vector<8x256xf32>
    %4 = vector.extract_strided_slice %3 {offsets = [0, 0], sizes = [8, 128], strides = [1, 1]} : vector<8x256xf32> to vector<8x128xf32>
    %5 = vector.extract_strided_slice %3 {offsets = [0, 128], sizes = [8, 128], strides = [1, 1]} : vector<8x256xf32> to vector<8x128xf32>
    %6 = arith.mulf %4, %4 : vector<8x128xf32>
    %7 = arith.mulf %5, %5 : vector<8x128xf32>
    %8 = arith.addf %6, %7 : vector<8x128xf32>
    %9 = math.sqrt %8 : vector<8x128xf32>
    %cst_3 = arith.constant dense<0.000000e+00> : vector<128xf32>
    %10 = vector.multi_reduction <add>, %9, %cst_3 [0] : vector<8x128xf32> to vector<128xf32>
    %11 = vector.shape_cast %10 : vector<128xf32> to vector<1x128xf32>
    %c0_4 = arith.constant 0 : index
    %c0_5 = arith.constant 0 : index
    %c0_6 = arith.constant 0 : index
    %12 = vector.load %arg3[%c0_4, %c0_5, %c0_6] : memref<1x2x128xf32, #tpu.memory_space<vmem>>, vector<1x1x128xf32>
    %13 = vector.shape_cast %12 : vector<1x1x128xf32> to vector<1x128xf32>
    %14 = vector.shape_cast %11 : vector<1x128xf32> to vector<1x1x128xf32>
    tpu.vector_store %arg3[%c0_4, %c0_5, %c0_6], %14 {strides = array<i32>} : memref<1x2x128xf32, #tpu.memory_space<vmem>>, vector<1x1x128xf32>,
    %15 = arith.mulf %9, %9 : vector<8x128xf32>
    %cst_7 = arith.constant dense<0.000000e+00> : vector<128xf32>
    %16 = vector.multi_reduction <add>, %15, %cst_7 [0] : vector<8x128xf32> to vector<128xf32>
    %17 = vector.shape_cast %16 : vector<128xf32> to vector<1x128xf32>
    %c0_8 = arith.constant 0 : index
    %c1 = arith.constant 1 : index
    %c0_9 = arith.constant 0 : index
    %18 = vector.load %arg3[%c0_8, %c1, %c0_9] : memref<1x2x128xf32, #tpu.memory_space<vmem>>, vector<1x1x128xf32>
    %19 = vector.shape_cast %18 : vector<1x1x128xf32> to vector<1x128xf32>
    %20 = vector.shape_cast %17 : vector<1x128xf32> to vector<1x1x128xf32>
    tpu.vector_store %arg3[%c0_8, %c1, %c0_9], %20 {strides = array<i32>} : memref<1x2x128xf32, #tpu.memory_space<vmem>>, vector<1x1x128xf32>,
    return
  }
  func.func @transform_0(%arg0: i32) -> (i32, i32) {
    %c0_i32 = arith.constant 0 : i32
    %c0_i32_0 = arith.constant 0 : i32
    return %arg0, %c0_i32 : i32, i32
  }
  func.func @transform_1(%arg0: i32) -> (i32, i32) {
    %c0_i32 = arith.constant 0 : i32
    %c0_i32_0 = arith.constant 0 : i32
    %c0_i32_1 = arith.constant 0 : i32
    return %c0_i32, %c0_i32_0 : i32, i32
  }
  func.func @transform_2(%arg0: i32) -> (i32, i32, i32) {
    %c0_i32 = arith.constant 0 : i32
    %c0_i32_0 = arith.constant 0 : i32
    %c0_i32_1 = arith.constant 0 : i32
    return %arg0, %c0_i32, %c0_i32_0 : i32, i32, i32
  }
}

</mosaic_0001>

<bundles_post_ra>
// kernel: tpu_custom_call.1
= control target key start
LH: loop header
LB: loop body
LE: loop exit
PB: predicated region body
PF: predicated region fallthrough
CT: control target
= control target key end

     0   :  { %7 = vsyncpa [#allocation3], 0  ;;  %s745_s0 = inlined_call_operand.hbm [shape: f32[16,32], index: 0, kind: input, shape index: {}]   ;;  %s746_s1 = inlined_call_operand.hbm [shape: bf16[32,256], index: 1, kind: input, shape index: {}]   ;;  %s747_s2 = inlined_call_operand.hbm [shape: f32[2,2,128], index: 2, kind: output, shape index: {}]  }
   0x1   :  { %9 = vsyncpa [#allocation3 + $0x1], 0 }
   0x2   :  { %10 = vsyncpa [#allocation6], 0 }
   0x3   :  { %11 = vsyncpa [#allocation4], 0 }
   0x4   :  { %13 = vsyncpa [#allocation4 + $0x1], 0  ;;  %s608_s9 = smov 0   ;;  %s610_s10 = smov 0  }
   0x5   :  { %s612_s11 = smov 0   ;;  %s614_s12 = smov 0  }
   0x6 LB: > { %s108_s15 = sshll.u32 %s746_s1, 4  ;;  %s632_s16 = sadd.s32 4294967295, %s588_s12   ;;  %s588_s12 = sphi %s614_s12, %s757_s12   ;;  %s584_s11 = sphi %s612_s11, %s756_s11   ;;  %s580_s10 = sphi %s610_s10, %s755_s10   ;;  %s576_s9 = sphi %s608_s9, %s754_s9   ;;  %s109_s15 = int_to_ptr.hbm [resolvable:$true] %s108_s15 }
   0x7   : > { %p362_p0 = scmp.ge.s32.totalorder %s588_s12, 1  ;;  %p40_p1 = scmp.eq.s32.totalorder %s632_s16, 0 }
   0x8   : > { %p97_p2 = scmp.lt.s32.totalorder %s588_s12, 3  ;;  %s590_s18 = smov [#allocation5]  }
   0x9   : > { %s110_s19 = sshll.u32 %s590_s18, 4  ;;  %s591_s20 = smov 128   ;;  %s111_s19 = int_to_ptr.vmem [resolvable:$true] %s110_s19 }
   0xa   : > { %p637_p3 = pnand %p362_p0, %p97_p2  ;;  %s592_s21 = smov 8  }
   0xb   : > { %s361_s22 = sadd.s32 4294967294, %s588_s12   ;;  %s648_s23 = sadd.s32 1, %s588_s12  }
   0xc   : > { %p405_p4 = pneg %p637_p3  ;;  %s26_s24 = sadd.s32 1, %s584_s11 }
   0xd   : > { %s23_s25 = ssub.s32 %s588_s12, %s648_s23  ;;  %p33_p7 = scmp.ne.s32.totalorder %s584_s11, %s580_s10 }
   0xe   : > { %p406_p6 = pnand %p405_p4, %p40_p1  ;;  %p24_p8 = scmp.eq.s32.totalorder %s23_s25, 0 }
   0xf   : > { %p34_p9 = scmp.eq.s32.totalorder %s588_s12, 0  ;;  %p39_p10 = scmp.ne.s32.totalorder %s580_s10, %s576_s9 }
  0x10   : > { %408 = dma.hbm_to_vmem [thread:$0]  (!%p406_p6), %s109_s15, 512, %s111_s19, [#allocation6], %s591_s20, %s591_s20, %s592_s21  }
  0x11   : > { %p84_p11 = scmp.eq.s32.totalorder %s632_s16, 1  ;;  %p664_p12 = por %p40_p1, %p39_p10 }
  0x12   : > { %s660_s26 = scalar_select %p24_p8, %s584_s11, %s26_s24  }
  0x13   : > { %p668_p13 = por %p84_p11, %p33_p7  ;;  %p90_p0 = scmp.eq.s32.totalorder %s361_s22, 1 }
  0x14   : > { %p35_p2 = por %p34_p9, %p33_p7  ;;  %s124_s29 = sand.u32 1, %s584_s11  }
  0x15   : > { %p673_p4 = por %p90_p0, %p39_p10  ;;  %p418_p6 = scmp.lt.s32.totalorder %s588_s12, 2 }
  0x16   : > { %s365_s3 = sshll.u32 %s124_s29, 3  ;;  %s366_s4 = sshll.u32 %s588_s12, 3 }
  0x17   : > { %s132_s7 = scalar_lea.hbm %s745_s0, %s366_s4  ;;  %s128_s13 = scalar_lea.vmem [#allocation2], %s365_s3 }
  0x18   : > { %s134_s8 = sshll.u32 %s132_s7, 4  ;;  %s136_s14 = sshll.u32 %s128_s13, 4  ;;  %s135_s8 = int_to_ptr.hbm [resolvable:$true] %s134_s8  ;;  %s137_s14 = int_to_ptr.vmem [resolvable:$true] %s136_s14 }
  0x19   : > { %p682_p8 = pnand %p418_p6, %p35_p2  ;;  %s125_s18 = scalar_lea.sflag [#allocation3], %s124_s29 }
  0x1a   : > { %s488_s19 = sshra.s32 %s135_s8, 4  ;;  %s495_s24 = scalar_lea.hbm %s745_s0, 16  ;;  %s489_s19 = int_to_ptr.hbm [resolvable:$true] %s488_s19 }
  0x1b   : > { %s490_s20 = scalar_lea.hbm %s489_s19, 8  ;;  %p492_p9 = pneg %p682_p8 }
  0x1c   : > { %p491_p7 = scmp.ne.s32.totalorder %s489_s19, %s490_s20  ;;  %p496_p0 = scmp.lt.s32.totalorder %s489_s19, %s745_s0 }
  0x1d   : > { %p497_p2 = scmp.lt.s32.totalorder %s495_s24, %s490_s20 }
  0x1e   : > { %p493_p10 = pnand %p492_p9, %p491_p7 }
  0x1f   : > { %p498_p6 = por %p497_p2, %p496_p0 }
  0x20   : > { %p494_p11 = pneg %p493_p10 }
  0x22   : > { %p499_p5 = pnand %p498_p6, %p494_p11 }
  0x24   : > { %502 = shalt.err (!%p499_p5)
}
  0x25   : > { %412 = dma.hbm_to_vmem [thread:$0]  (!%p682_p8), %s135_s8, 128, %s137_s14, %s125_s18  }
  0x26   : > { %145 = sbr.rel (%p637_p3) target bundleno = 225 (0xe1), region = 28  ;;  %s699_s29 = sand.u32 (!%p637_p3), 1, %s580_s10  }
  0x27   : > { %s368_s4 = sshll.u32 (!%p637_p3), %s699_s29, 3  ;;  %s148_s5 = scalar_lea.sflag (!%p637_p3), [#allocation3], %s699_s29 }
  0x28   : > { %s151_s6 = scalar_lea.vmem (!%p637_p3), [#allocation2], %s368_s4 }
  0x2b   : > { %563 = dma.done.wait (%p664_p12), %s148_s5, 128  }
  0x2c   : > { %565 = vsyncadd (%p664_p12), %s148_s5, 4294967168 }
  0x2d   : > { %567 = dma.done.wait (%p40_p1), [#allocation6], 512  }
  0x2e   : > { %569 = vsyncadd (%p40_p1), [#allocation6], 4294966784  ;;  %v381_v0 = vld [vmem:[#allocation5 + $0x10] sm:$0xf]  ;;  %v396_v1 = vld [vmem:[#allocation5 + $0x14] sm:$0xf0] }
  0x2f   : > { %v395_v2 = vld [vmem:[#allocation5 + $0x14] sm:$0xf]  ;;  %v382_v3 = vor.u32 %v396_v1, %v381_v0  ;;  %v383_v4 = vld [vmem:[#allocation5 + $0x18] sm:$0xf0]  ;;  %v373_v5 = vld [vmem:[#allocation5] sm:$0xf] }
  0x30   : > { %v394_v6 = vld [vmem:[#allocation5 + $0x4] sm:$0xf0]  ;;  %v386_v7 = vor.u32 %v395_v2, %v383_v4  ;;  %v393_v8 = vld [vmem:[#allocation5 + $0x4] sm:$0xf]  ;;  %v375_v9 = vld [vmem:[#allocation5 + $0x8] sm:$0xf0] }
  0x31   : > { %215 = vmatpush.bf16.msra.mxu0 %v382_v3  ;;  %v374_v10 = vor.u32 %v394_v6, %v373_v5  ;;  %v179_v11 = vld [vmem:[%s151_s6] sm:$0xff]  ;;  %v378_v12 = vor.u32 %v393_v8, %v375_v9  ;;  %vm205_vm0 = vcmask 261120   ;;  %s370_s17 = sshll.u32 %s699_s29, 1  ;;  %s390_s27 = sshll.u32 %s632_s16, 1 }
  0x32   : > { %228 = vmatpush.bf16.msra.mxu1 %v386_v7  ;;  %v180_v13 = vpack.c.bf16 %v179_v11, %v179_v11  ;;  %s276_s13 = scalar_lea.hbm %s747_s2, %s390_s27  ;;  %s177_s14 = scalar_lea.vmem [#allocation7], %s370_s17 }
  0x33   : > { %s278_s15 = sshll.u32 %s177_s14, 4  ;;  %s280_s18 = sshll.u32 %s276_s13, 4  ;;  %s279_s15 = int_to_ptr.vmem [resolvable:$true] %s278_s15  ;;  %s281_s18 = int_to_ptr.hbm [resolvable:$true] %s280_s18 }
  0x34   : > { %s266_s16 = scalar_lea.sflag [#allocation4], %s699_s29  ;;  %s532_s19 = sshra.s32 %s281_s18, 4  ;;  %s533_s19 = int_to_ptr.hbm [resolvable:$true] %s532_s19 }
  0x35   : > { %216 = vmatpush.bf16.msra.mxu0 %v374_v10  ;;  %s534_s20 = scalar_lea.hbm %s533_s19, 2  ;;  %s538_s24 = scalar_lea.hbm %s747_s2, 4 }
  0x36   : > { %229 = vmatpush.bf16.msra.mxu1 %v378_v12  ;;  %p535_p1 = scmp.ne.s32.totalorder %s533_s19, %s534_s20  ;;  %p539_p12 = scmp.lt.s32.totalorder %s533_s19, %s747_s2 }
  0x37   : > { %p540_p8 = scmp.lt.s32.totalorder %s538_s24, %s534_s20 }
  0x38   : > { %387 = vmatmul.msk.bf16.vlgmr.msra.gmra.mxu0 %vm205_vm0, %v180_v13  ;;  %p536_p3 = pnand %p535_p1, %p668_p13 }
  0x39   : > { %388 = vmatmul.msk.bf16.vlgmr.msra.gmra.mxu1 %vm205_vm0, %v180_v13  ;;  %p541_p7 = por %p540_p8, %p539_p12 }
  0x3a   : > { %p537_p5 = pneg %p536_p3 }
  0x3c   : > { %p542_p9 = pnand %p541_p7, %p537_p5 }
  0xb5   : > { %v218_v14 = vpop.f32.mrf.mxu0 }
  0xb6   : > { %v235_v15 = vmul.f32 %v218_v14, %v218_v14  ;;  %v231_v16 = vpop.f32.mrf.mxu1 }
  0xb7   : > { %v236_v17 = vmul.f32 %v231_v16, %v231_v16 }
  0xb9   : > { %v237_v18 = vadd.f32 %v236_v17, %v235_v15 }
  0xbb   : > { %456 = vrsqrt.f32 %v237_v18  ;;  %vm245_vm1 = vcmp.eq.f32.partialorder %v237_v18, inf  ;;  %v248_v28 = vand.u32 2147483648, %v237_v18  ;;  %vm247_vm2 = vcmp.eq.f32.partialorder %v237_v18, 0.0 }
  0xbd   : > { %v220_v19 = vpop.f32.mrf.mxu0 }
  0xbe   : > { %v233_v20 = vpop.f32.mrf.mxu1 }
  0xc1   : > { %v457_v21 = vpop.eup %456 }
  0xc2   : > { %v239_v22 = vmul.f32 %v457_v21, %v237_v18 }
  0xc4   : > { %v240_v23 = vmul.f32 %v457_v21, %v239_v22 }
  0xc6   : > { %v241_v24 = vmul.f32 0.5, %v240_v23 }
  0xc8   : > { %v242_v25 = vsub.f32 1.5, %v241_v24 }
  0xca   : > { %v243_v26 = vmul.f32 %v457_v21, %v242_v25 }
  0xcc   : > { %v244_v27 = vmul.f32 %v243_v26, %v237_v18 }
  0xce   : > { %v246_v29 = vsel %vm245_vm1, %v237_v18, %v244_v27 }
  0xcf   : > { %v249_v30 = vsel %vm247_vm2, %v248_v28, %v246_v29 }
  0xd0   : > { %v250_v31 = vrot.slane %v249_v30, 4  ;;  %v257_v32 = vmul.f32 %v249_v30, %v249_v30 }
  0xd2   : > { %v251_v33 = vadd.f32 %v250_v31, %v249_v30  ;;  %v258_v34 = vrot.slane %v257_v32, 4 }
  0xd4   : > { %v252_v35 = vrot.slane %v251_v33, 2  ;;  %v259_v36 = vadd.f32 %v258_v34, %v257_v32 }
  0xd6   : > { %v253_v37 = vadd.f32 %v252_v35, %v251_v33  ;;  %v260_v38 = vrot.slane %v259_v36, 2 }
  0xd8   : > { %v254_v39 = vrot.slane %v253_v37, 1  ;;  %v261_v40 = vadd.f32 %v260_v38, %v259_v36 }
  0xda   : > { %v255_v41 = vadd.f32 %v254_v39, %v253_v37  ;;  %v262_v42 = vrot.slane %v261_v40, 1 }
  0xdc   : > { %256 = vst [vmem:[%s177_s14] sm:$0x1] %v255_v41  ;;  %v263_v43 = vadd.f32 %v262_v42, %v261_v40 }
  0xde   : > { %264 = vst [vmem:[%s177_s14 + $0x1] sm:$0x1] %v263_v43 }
  0xdf   : > { %545 = shalt.err (!%p542_p9)
}
  0xe0   : > { %403 = dma.vmem_to_hbm [thread:$0]  (%p668_p13), %s279_s15, 32, %s281_s18, %s266_s16  }
  0xe1 PF: > { %s292_s29 = sand.u32 1, %s576_s9   ;;  %p753_p10 = scmp.ge.s32.totalorder %s588_s12, 2 }
  0xe2   : > { %s293_s4 = scalar_lea.sflag [#allocation4], %s292_s29 }
  0xe3   : > { %p414_p11 = pnand %p753_p10, %p673_p4 }
  0xe5   : > { %p415_p0 = pneg %p414_p11 }
  0xe7   : > { %571 = dma.done.wait (%p415_p0), %s293_s4, 32  }
  0xe8   : > { %573 = vsyncadd (%p415_p0), %s293_s4, 4294967264  ;;  %p16_p2 = scmp.ge.s32.totalorder %s648_s23, 4   ;;  %s754_s9 = smov %s580_s10 }
  0xe9   : > { %s755_s10 = smov %s584_s11  ;;  %s756_s11 = smov %s660_s26 }
  0xea   : > { %s757_s12 = smov %s648_s23  ;;  %18 = sbr.rel (!%p16_p2) target bundleno = 6 (0x6), region = 77 }
  0xef   :  { %299 = vsyncpa [#allocation3], 1 }
  0xf0   :  { %301 = vsyncpa [#allocation3 + $0x1], 1 }
  0xf1   :  { %302 = vsyncpa [#allocation6], 1 }
  0xf2   :  { %303 = vsyncpa [#allocation4], 1 }
  0xf3   :  { %305 = vsyncpa [#allocation4 + $0x1], 1 }

</bundles_post_ra>
